<compile_context>
chip_gen: v6e
topology: v6e:2x2x1
jax: 0.10.0
libtpu: 0.0.40
codegen_flags: <defaults>
</compile_context>

<pallas_src>
import functools

import jax
import jax.numpy as jnp
from jax.experimental import pallas as pl
from jax.experimental.pallas import tpu as pltpu


def _round_up(n, m):
    return ((n + m - 1) // m) * m


def _tpu_caps():
    """Return (physical VMEM/TC, usable VMEM budget/TC, TensorCores per chip)."""
    vmem_cap = 64 << 20          # conservative default (v7x per-TC VMEM)
    cores = 1
    try:
        info = pltpu.get_tpu_info()
        vmem_cap = int(getattr(info, "vmem_capacity_bytes", vmem_cap))
        for name in ("num_cores", "tensorcores_per_chip", "num_tensorcores"):
            v = getattr(info, name, None)
            if v:
                cores = max(cores, int(v))
                break
    except Exception:
        pass
    try:
        kind = jax.devices()[0].device_kind.lower()
        if "7" in kind:          # v7x: 2 TensorCores per chip
            cores = max(cores, 2)
    except Exception:
        pass
    # Headroom for Mosaic internal scratch:
    #   v7x (64 MiB)  -> ~54 MiB usable;  v5e/v6e (128 MiB) -> ~108 MiB usable.
    budget = max(min(vmem_cap - (8 << 20), int(vmem_cap * 0.85)), 24 << 20)
    return vmem_cap, budget, cores


def _plan_tiles(M, H, x_itm, w_itm, b_itm, budget, num_cores):
    """VMEM-aware (tm, tn) plan.  Prefers whole-resident weight (tn == H)."""
    row_align = 16 if x_itm == 2 else 8       # bf16 packs sublanes in pairs
    min_tm = min(M, row_align)

    def need(tm, tn):
        n_w_buf = 1 if tn == H else 2
        return (n_w_buf * (H * tn * w_itm + tn * b_itm)   # weight + bias
                + 2 * tm * H * x_itm                      # streaming x (2 bufs)
                + 2 * tm * tn * x_itm)                    # streaming out (2 bufs)

    # --- tn: whole W resident if it leaves room for at least a minimal row
    #     tile; otherwise the largest 128-multiple divisor of H that fits.
    tn = H
    if need(min_tm, H) > budget:
        cands = [d for d in range(128, H, 128) if H % d == 0]
        if cands:
            tn = min(cands)
            for c in sorted(cands, reverse=True):
                if need(min_tm, c) <= budget:
                    tn = c
                    break
        # else: H has no 128-multiple divisor; keep tn = H and rely on the
        # vmem_limit clamp (extreme H with odd sizes is out of scope).

    # --- tm: as large as the remaining budget allows (HBM-roofline efficiency).
    n_w_buf = 1 if tn == H else 2
    avail = budget - n_w_buf * (H * tn * w_itm + tn * b_itm)
    per_row = 2 * H * x_itm + 2 * tn * x_itm
    tm_cap = (avail // per_row) if avail > per_row * row_align else row_align
    tm_cap = min(max(int(tm_cap), row_align), 2048)   # amortization saturates
    tm = min(M, tm_cap)
    if tm < M:
        tm = max((tm // row_align) * row_align, row_align)

    # --- row split: only force multiple programs where both TensorCores get
    #     work (v7x); always balance so the last block is not a sliver.
    grid_m = pl.cdiv(M, tm)
    if num_cores > 1 and grid_m < num_cores and M >= num_cores * row_align:
        grid_m = num_cores
    if grid_m > 1:
        grid_m = _round_up(grid_m, num_cores)
        tm = min(M, _round_up(pl.cdiv(M, grid_m), row_align))
        grid_m = pl.cdiv(M, tm)
    return tm, tn


def residual_linear_kernel(x_ref, w_ref, b_ref, o_ref, *, tn):
    """o = x + x @ W_t + b on one (tm, tn) output tile, fused in VMEM."""
    j = pl.program_id(1)                                    # out-feature tile
    x = x_ref[...]                                          # [tm, H]
    y = jnp.dot(x.astype(w_ref.dtype), w_ref[...],
                preferred_element_type=jnp.float32)         # MXU, f32 acc
    off = pl.multiple_of(j * tn, tn)
    x_res = x_ref[:, pl.ds(off, tn)]                        # residual slice
    o_ref[...] = (x_res.astype(jnp.float32) + y
                  + b_ref[...].astype(jnp.float32)).astype(o_ref.dtype)


def residual_linear(x, w_t, b, *, tm=None, tn=None):
    """x + x @ w_t + b via a fused Pallas TPU kernel.

    x: [M, H] (f32 or bf16); w_t: [H, H] (in_features x out_features, ideally
    bf16); b: [1, H].  Output dtype == x dtype.
    """
    M, H = x.shape
    assert w_t.shape == (H, H), w_t.shape
    b = b.reshape(1, H)

    x_itm = jnp.dtype(x.dtype).itemsize
    w_itm = jnp.dtype(w_t.dtype).itemsize
    b_itm = jnp.dtype(b.dtype).itemsize

    vmem_cap, budget, num_cores = _tpu_caps()
    auto_tm, auto_tn = _plan_tiles(M, H, x_itm, w_itm, b_itm, budget, num_cores)
    tm = auto_tm if tm is None else min(int(tm), M)
    tn = auto_tn if tn is None else min(int(tn), H)

    grid_m = pl.cdiv(M, tm)
    grid_n = pl.cdiv(H, tn)
    if grid_n > 1:
        # The in-kernel residual slice assumes exact N tiling.
        assert H % tn == 0, "N tile must divide H when grid_n > 1"

    n_w_buf = 1 if grid_n == 1 else 2
    vmem_need = (2 * tm * H * x_itm            # x tiles (double-buffered)
                 + 2 * tm * tn * x_itm         # out tiles (double-buffered)
                 + n_w_buf * H * tn * w_itm    # weight buffer(s)
                 + n_w_buf * tn * b_itm)       # bias buffer(s)
    vmem_limit = int(min(max(vmem_need + (4 << 20), 16 << 20), vmem_cap))

    w_reads = grid_m if grid_n > 1 else 1      # W column blocks re-stream per row tile
    cost = pl.CostEstimate(
        flops=2 * M * H * H,
        transcendentals=0,
        bytes_accessed=(M * H * x_itm              # read x once
                        + w_reads * H * H * w_itm  # read W
                        + H * b_itm                # read b
                        + M * H * x_itm),          # write out
    )

    in_specs = [
        # Streaming x row tile; constant across the inner N axis -> no re-DMA.
        pl.BlockSpec((tm, H), lambda i, j: (i, 0)),
    ]
    if grid_n == 1:
        # Grid-invariant weight & bias: single buffer, DMA'd once.
        in_specs += [
            pl.BlockSpec((H, tn), lambda i, j: (0, j),
                         pipeline_mode=pl.Buffered(1)),
            pl.BlockSpec((1, tn), lambda i, j: (0, j),
                         pipeline_mode=pl.Buffered(1)),
        ]
    else:
        # Weight column blocks stream along the inner N axis: keep default
        # double-buffering so the DMA overlaps the matmul.
        in_specs += [
            pl.BlockSpec((H, tn), lambda i, j: (0, j)),
            pl.BlockSpec((1, tn), lambda i, j: (0, j)),
        ]

    kernel = functools.partial(residual_linear_kernel, tn=tn)

    return pl.pallas_call(
        kernel,
        out_shape=jax.ShapeDtypeStruct((M, H), x.dtype),
        grid_spec=pltpu.PrefetchScalarGridSpec(
            num_scalar_prefetch=0,
            grid=(grid_m, grid_n),
            in_specs=in_specs,
            out_specs=pl.BlockSpec((tm, tn), lambda i, j: (i, j)),
        ),
        compiler_params=pltpu.CompilerParams(
            # Row axis shards across TensorCores on v7x; both axes independent.
            dimension_semantics=("parallel", "parallel"),
            vmem_limit_bytes=vmem_limit,
        ),
        cost_estimate=cost,
    )(x, w_t, b)


class Residual:
    """JAX mirror of PyTorch Residual[T]: op(input, module(input)).

    `module` is an nn.Linear(hidden, hidden) realized as the fused Pallas
    kernel above; `op` (default add) is fused into the same kernel.  The weight
    is stored once in bf16 (halves HBM bytes of a bandwidth-bound kernel; MXU
    is bf16-native).  Pass bf16 `x` to also halve activation traffic (accuracy
    tradeoff — the matmul accumulate / bias / residual add stay f32 either way).
    """

    def __init__(self, w_t, b, weight_dtype=jnp.bfloat16):
        self.w_t = jnp.asarray(w_t, weight_dtype)
        self.b = jnp.asarray(b, jnp.float32)

    def __call__(self, x):
        return residual_linear(x, self.w_t, self.b)


if __name__ == "__main__":
    # Small but non-degenerate shapes.
    M, H = 64, 256
    key = jax.random.PRNGKey(0)
    kx, kw, kb = jax.random.split(key, 3)

    x = jax.random.normal(kx, (M, H), dtype=jnp.float32)
    # Deterministic synthetic Linear parameters (PyTorch layout: W is [out, in]).
    w = jax.random.normal(kw, (H, H), dtype=jnp.float32) * (1.0 / jnp.sqrt(H))
    b = jax.random.normal(kb, (1, H), dtype=jnp.float32) * 0.1
    w_t = w.T  # pre-transpose so the kernel does x @ w_t  (== x @ W^T)

    ref = x + (x @ w_t + b)   # full-f32 reference: input + Linear(input)

    # 1) Default (auto-planned) path: whole-resident weight, 1-2 row programs.
    model = Residual(w_t, b)
    out = jax.block_until_ready(model(x))
    assert out.shape == (M, H) and out.dtype == x.dtype
    assert jnp.allclose(out, ref, atol=3e-2, rtol=3e-2), (
        f"auto path mismatch: max abs err {jnp.max(jnp.abs(out - ref))}")

    # 2) Forced 2x2 grid: exercises the N-tiled weight path and the in-kernel
    #    residual column slice (what large-H runs use on v7x).
    out2 = jax.block_until_ready(
        residual_linear(x, model.w_t, model.b, tm=32, tn=128))
    assert jnp.allclose(out2, ref, atol=3e-2, rtol=3e-2), (
        f"tiled path mismatch: max abs err {jnp.max(jnp.abs(out2 - ref))}")

    print("KERNEL_OK")
</pallas_src>

<mosaic_0001>
module attributes {stable_mosaic.version = 11 : i64} {
  func.func @residual_linear_kernel(%arg0: i32, %arg1: i32, %arg2: memref<64x256xf32, #tpu.memory_space<vmem>>, %arg3: memref<256x256xbf16, #tpu.memory_space<vmem>>, %arg4: memref<1x256xf32, #tpu.memory_space<vmem>>, %arg5: memref<64x256xf32, #tpu.memory_space<vmem>>) attributes {dimension_semantics = [#tpu.dimension_semantics<parallel>, #tpu.dimension_semantics<parallel>], iteration_bounds = array<i64: 1, 1>, scalar_prefetch = 0 : i64, scratch_operands = 0 : i64, tpu.core_type = #tpu.core_type<tc>, window_params = [{transform_indices = @transform_0, window_bounds = array<i64: 64, 256>}, {pipeline_mode = #tpu.pipeline_mode<synchronous>, transform_indices = @transform_1, window_bounds = array<i64: 256, 256>}, {pipeline_mode = #tpu.pipeline_mode<synchronous>, transform_indices = @transform_2, window_bounds = array<i64: 1, 256>}, {transform_indices = @transform_3, window_bounds = array<i64: 64, 256>}]} {
    %c0 = arith.constant 0 : index
    %c0_0 = arith.constant 0 : index
    %0 = vector.load %arg2[%c0, %c0_0] : memref<64x256xf32, #tpu.memory_space<vmem>>, vector<64x256xf32>
    %1 = arith.truncf %0 : vector<64x256xf32> to vector<64x256xbf16>
    %c0_1 = arith.constant 0 : index
    %c0_2 = arith.constant 0 : index
    %2 = vector.load %arg3[%c0_1, %c0_2] : memref<256x256xbf16, #tpu.memory_space<vmem>>, vector<256x256xbf16>
    %cst = arith.constant dense<0.000000e+00> : vector<64x256xf32>
    %3 = tpu.matmul %1, %2, %cst {dimension_numbers = #tpu.dot_dimension_numbers<[1], [0], [0], [1], [0, 0, 1, 1], [], []>} : vector<64x256xbf16>, vector<256x256xbf16>, vector<64x256xf32> -> vector<64x256xf32>
    %c256_i32 = arith.constant 256 : i32
    %4 = arith.muli %arg1, %c256_i32 : i32
    %5 = tpu.assume_multiple %4, 256 : i32
    %c0_3 = arith.constant 0 : index
    %6 = arith.index_cast %5 : i32 to index
    %7 = vector.load %arg2[%c0_3, %6] : memref<64x256xf32, #tpu.memory_space<vmem>>, vector<64x256xf32>
    %8 = arith.addf %7, %3 : vector<64x256xf32>
    %c0_4 = arith.constant 0 : index
    %c0_5 = arith.constant 0 : index
    %9 = vector.load %arg4[%c0_4, %c0_5] : memref<1x256xf32, #tpu.memory_space<vmem>>, vector<1x256xf32>
    %10 = vector.broadcast %9 : vector<1x256xf32> to vector<64x256xf32>
    %11 = arith.addf %8, %10 : vector<64x256xf32>
    %c0_6 = arith.constant 0 : index
    %c0_7 = arith.constant 0 : index
    %12 = vector.load %arg5[%c0_6, %c0_7] : memref<64x256xf32, #tpu.memory_space<vmem>>, vector<64x256xf32>
    tpu.vector_store %arg5[%c0_6, %c0_7], %11 {strides = array<i32>} : memref<64x256xf32, #tpu.memory_space<vmem>>, vector<64x256xf32>,
    return
  }
  func.func @transform_0(%arg0: i32, %arg1: i32) -> (i32, i32) {
    %c0_i32 = arith.constant 0 : i32
    %c0_i32_0 = arith.constant 0 : i32
    return %arg0, %c0_i32 : i32, i32
  }
  func.func @transform_1(%arg0: i32, %arg1: i32) -> (i32, i32) {
    %c0_i32 = arith.constant 0 : i32
    %c0_i32_0 = arith.constant 0 : i32
    return %c0_i32, %arg1 : i32, i32
  }
  func.func @transform_2(%arg0: i32, %arg1: i32) -> (i32, i32) {
    %c0_i32 = arith.constant 0 : i32
    %c0_i32_0 = arith.constant 0 : i32
    return %c0_i32, %arg1 : i32, i32
  }
  func.func @transform_3(%arg0: i32, %arg1: i32) -> (i32, i32) {
    %c0_i32 = arith.constant 0 : i32
    return %arg0, %arg1 : i32, i32
  }
}

</mosaic_0001>

<bundles_post_ra>
// kernel: tpu_custom_call.1
= control target key start
LH: loop header
LB: loop body
LE: loop exit
PB: predicated region body
PF: predicated region fallthrough
CT: control target
= control target key end

     0   :  { %8 = vsyncpa [#allocation3], 0  ;;  %s695_s0 = inlined_call_operand.hbm [shape: f32[64,256], index: 0, kind: input, shape index: {}]   ;;  %s696_s1 = inlined_call_operand.hbm [shape: bf16[256,256], index: 1, kind: input, shape index: {}]   ;;  %s697_s2 = inlined_call_operand.vmem [shape: f32[1,256], index: 2, kind: input, shape index: {}]   ;;  %s698_s3 = inlined_call_operand.hbm [shape: f32[64,256], index: 3, kind: output, shape index: {}]  }
   0x1   :  { %9 = vsyncpa [#allocation6], 0 }
   0x2   :  { %10 = vsyncpa [#allocation4], 0  ;;  %s618_s12 = smov [#allocation2]  }
   0x3   :  { %s16_s13 = sshll.u32 %s618_s12, 4  ;;  %s17_s13 = int_to_ptr.vmem [resolvable:$true] %s16_s13 }
   0x4   :  { %s560_s14 = scalar_lea.vmem %s17_s13, 2048  ;;  %p565_p1 = scmp.lt.s32.totalorder %s17_s13, %s17_s13 }
   0x5   :  { %p561_p0 = scmp.ne.s32.totalorder %s17_s13, %s560_s14  ;;  %p566_p2 = scmp.lt.s32.totalorder %s560_s14, %s560_s14 }
   0x7   :  { %p567_p3 = por %p566_p2, %p565_p1 }
   0x9   :  { %p568_p4 = pnand %p567_p3, %p561_p0 }
   0xb   :  { %571 = shalt.err (!%p568_p4)
}
   0xc   :  { %s619_s15 = smov 256   ;;  %s620_s16 = smov 16  }
   0xd   :  { %22 = dma.hbm_to_vmem [thread:$0]  %s695_s0, 2048, %s17_s13, [#allocation3], %s619_s15, %s619_s15, %s620_s16  }
   0xe   :  { %s621_s19 = smov [#allocation5]  }
   0xf   :  { %s28_s20 = sshll.u32 %s621_s19, 4  ;;  %s29_s20 = int_to_ptr.vmem [resolvable:$true] %s28_s20 }
  0x10   :  { %s580_s21 = scalar_lea.vmem %s29_s20, 4096  ;;  %p585_p6 = scmp.lt.s32.totalorder %s29_s20, %s29_s20 }
  0x11   :  { %p581_p5 = scmp.ne.s32.totalorder %s29_s20, %s580_s21  ;;  %p586_p7 = scmp.lt.s32.totalorder %s580_s21, %s580_s21 }
  0x13   :  { %p587_p8 = por %p586_p7, %p585_p6 }
  0x15   :  { %p588_p9 = pnand %p587_p8, %p581_p5 }
  0x17   :  { %591 = shalt.err (!%p588_p9)
}
  0x18   :  { %s622_s22 = smov 128   ;;  %s623_s23 = smov 8  }
  0x19   :  { %34 = dma.hbm_to_vmem [thread:$0]  %s696_s1, 4096, %s29_s20, [#allocation6], %s622_s22, %s622_s22, %s623_s23  }
  0x1a   :  { %612 = dma.done.wait [#allocation3], 2048  }
  0x1b   :  { %613 = vsyncadd [#allocation3], 4294965248 }
  0x1c   :  { %614 = dma.done.wait [#allocation6], 4096  }
  0x1d   :  { %615 = vsyncadd [#allocation6], 4294963200  ;;  %v504_v0 = vld [vmem:[#allocation5 + $0x74] ss:$8 sps:$4 sm:$0xff]   ;;  %v506_v1 = vld [vmem:[#allocation5 + $0x70] ss:$8 sps:$4 sm:$0xff]   ;;  %v371_v56 = vlaneseq }
  0x1e   :  { %259 = vmatprep.subr.bf16.mxu0 %v504_v0  ;;  %465 = vmatprep.subr.bf16.mxu1 %v504_v0  ;;  %v507_v2 = vld [vmem:[#allocation5 + $0x64] ss:$8 sps:$4 sm:$0xff]   ;;  %v509_v3 = vld [vmem:[#allocation5 + $0x60] ss:$8 sps:$4 sm:$0xff]   ;;  %v510_v4 = vld [vmem:[#allocation5 + $0x54] ss:$8 sps:$4 sm:$0xff]  }
  0x1f   :  { %260 = vmatpush1.bf16.msra.mxu0 %v506_v1  ;;  %481 = vmatpush1.bf16.msra.mxu1 %v506_v1  ;;  %v512_v5 = vld [vmem:[#allocation5 + $0x50] ss:$8 sps:$4 sm:$0xff]   ;;  %v513_v6 = vld [vmem:[#allocation5 + $0x44] ss:$8 sps:$4 sm:$0xff]   ;;  %v515_v7 = vld [vmem:[#allocation5 + $0x40] ss:$8 sps:$4 sm:$0xff]  }
  0x20   :  { %261 = vmatprep.subr.bf16.mxu0 %v507_v2  ;;  %466 = vmatprep.subr.bf16.mxu1 %v507_v2  ;;  %v516_v8 = vld [vmem:[#allocation5 + $0x34] ss:$8 sps:$4 sm:$0xff]   ;;  %v518_v9 = vld [vmem:[#allocation5 + $0x30] ss:$8 sps:$4 sm:$0xff]   ;;  %v519_v10 = vld [vmem:[#allocation5 + $0x24] ss:$8 sps:$4 sm:$0xff]  }
  0x21   :  { %v521_v11 = vld [vmem:[#allocation5 + $0x20] ss:$8 sps:$4 sm:$0xff]   ;;  %v522_v12 = vld [vmem:[#allocation5 + $0x14] ss:$8 sps:$4 sm:$0xff]   ;;  %v524_v18 = vld [vmem:[#allocation5 + $0x10] ss:$8 sps:$4 sm:$0xff]  }
  0x22   :  { %v654_v13 = vld [vmem:[#allocation2 + $0x8] sm:$0xff]  ;;  %v656_v14 = vld [vmem:[#allocation2 + $0x18] sm:$0xff]  ;;  %v43_v38 = vld [vmem:[#allocation2] sm:$0xff]  ;;  %v372_v57 = vshrl.u32 %v371_v56, 7 }
  0x23   :  { %262 = vmatpush1.bf16.msra.mxu0 %v509_v3  ;;  %482 = vmatpush1.bf16.msra.mxu1 %v509_v3  ;;  %v60_v15 = vpack.c.bf16 %v656_v14, %v654_v13  ;;  %v660_v16 = vld [vmem:[#allocation2 + $0x48] sm:$0xff]  ;;  %v662_v17 = vld [vmem:[#allocation2 + $0x58] sm:$0xff]  ;;  %v45_v39 = vld [vmem:[#allocation2 + $0x10] sm:$0xff] }
  0x24   :  { %263 = vmatprep.subr.bf16.mxu0 %v510_v4  ;;  %467 = vmatprep.subr.bf16.mxu1 %v510_v4  ;;  %v64_v19 = vpack.c.bf16 %v662_v17, %v660_v16  ;;  %v525_v20 = vld [vmem:[#allocation5 + $0x4] ss:$8 sps:$4 sm:$0xff]   ;;  %v527_v21 = vld [vmem:[#allocation5] ss:$8 sps:$4 sm:$0xff]   ;;  %v528_v22 = vld [vmem:[#allocation5 + $0xf4] ss:$8 sps:$4 sm:$0xff]   ;;  %v59_v46 = vpack.c.bf16 %v45_v39, %v43_v38 }
  0x25   :  { %291 = vmatprep.mubr.bf16.mxu0 %v60_v15  ;;  %v530_v23 = vld [vmem:[#allocation5 + $0xf0] ss:$8 sps:$4 sm:$0xff]   ;;  %v531_v24 = vld [vmem:[#allocation5 + $0xe4] ss:$8 sps:$4 sm:$0xff]   ;;  %v533_v25 = vld [vmem:[#allocation5 + $0xe0] ss:$8 sps:$4 sm:$0xff]  }
  0x26   :  { %311 = vmatprep.mubr.bf16.mxu1 %v64_v19  ;;  %v534_v26 = vld [vmem:[#allocation5 + $0xd4] ss:$8 sps:$4 sm:$0xff]   ;;  %v536_v27 = vld [vmem:[#allocation5 + $0xd0] ss:$8 sps:$4 sm:$0xff]   ;;  %v537_v28 = vld [vmem:[#allocation5 + $0xc4] ss:$8 sps:$4 sm:$0xff]  }
  0x27   :  { %264 = vmatpush1.bf16.msra.mxu0 %v512_v5  ;;  %483 = vmatpush1.bf16.msra.mxu1 %v512_v5  ;;  %v539_v29 = vld [vmem:[#allocation5 + $0xc0] ss:$8 sps:$4 sm:$0xff]   ;;  %v540_v30 = vld [vmem:[#allocation5 + $0xb4] ss:$8 sps:$4 sm:$0xff]   ;;  %v542_v31 = vld [vmem:[#allocation5 + $0xb0] ss:$8 sps:$4 sm:$0xff]  }
  0x28   :  { %265 = vmatprep.subr.bf16.mxu0 %v513_v6  ;;  %468 = vmatprep.subr.bf16.mxu1 %v513_v6  ;;  %v543_v32 = vld [vmem:[#allocation5 + $0xa4] ss:$8 sps:$4 sm:$0xff]   ;;  %v545_v33 = vld [vmem:[#allocation5 + $0xa0] ss:$8 sps:$4 sm:$0xff]   ;;  %v546_v34 = vld [vmem:[#allocation5 + $0x94] ss:$8 sps:$4 sm:$0xff]  }
  0x29   :  { %v548_v35 = vld [vmem:[#allocation5 + $0x90] ss:$8 sps:$4 sm:$0xff]   ;;  %v549_v36 = vld [vmem:[#allocation5 + $0x84] ss:$8 sps:$4 sm:$0xff]   ;;  %v551_v37 = vld [vmem:[#allocation5 + $0x80] ss:$8 sps:$4 sm:$0xff]  }
  0x2a   :  { %v51_v40 = vld [vmem:[#allocation2 + $0x40] sm:$0xff]  ;;  %v53_v41 = vld [vmem:[#allocation2 + $0x50] sm:$0xff]  ;;  %v666_v42 = vld [vmem:[#allocation2 + $0x28] sm:$0xff]  ;;  %v373_v58 = vsub.s32 0, %v372_v57  ;;  %v377_v60 = vsub.s32 1, %v372_v57 }
  0x2b   :  { %266 = vmatpush1.bf16.msra.mxu0 %v515_v7  ;;  %484 = vmatpush1.bf16.msra.mxu1 %v515_v7  ;;  %v668_v43 = vld [vmem:[#allocation2 + $0x38] sm:$0xff]  ;;  %v670_v44 = vld [vmem:[#allocation2 + $0x68] sm:$0xff]  ;;  %v63_v47 = vpack.c.bf16 %v53_v41, %v51_v40  ;;  %v47_v50 = vld [vmem:[#allocation2 + $0x20] sm:$0xff] }
  0x2c   :  { %267 = vmatprep.subr.bf16.mxu0 %v516_v8  ;;  %469 = vmatprep.subr.bf16.mxu1 %v516_v8  ;;  %v672_v45 = vld [vmem:[#allocation2 + $0x78] sm:$0xff]  ;;  %v62_v48 = vpack.c.bf16 %v668_v43, %v666_v42  ;;  %v49_v51 = vld [vmem:[#allocation2 + $0x30] sm:$0xff]  ;;  %v55_v52 = vld [vmem:[#allocation2 + $0x60] sm:$0xff] }
  0x2d   :  { %v66_v49 = vpack.c.bf16 %v672_v45, %v670_v44  ;;  %v57_v53 = vld [vmem:[#allocation2 + $0x70] sm:$0xff]  ;;  %v61_v54 = vpack.c.bf16 %v49_v51, %v47_v50  ;;  %v369_v59 = vld [vmem:[%s697_s2] sm:$0x3]  ;;  %s624_s2 = smov [#allocation7]  }
  0x2e   :  { %v65_v55 = vpack.c.bf16 %v57_v53, %v55_v52  ;;  %v374_v61 = vrot.slane %v369_v59, %v373_v58  ;;  %v378_v2 = vrot.slane %v369_v59, %v377_v60  ;;  %s418_s26 = sshll.u32 %s624_s2, 4  ;;  %s419_s26 = int_to_ptr.vmem [resolvable:$true] %s418_s26 }
  0x2f   :  { %268 = vmatpush1.bf16.msra.mxu0 %v518_v9  ;;  %485 = vmatpush1.bf16.msra.mxu1 %v518_v9  ;;  %s592_s27 = scalar_lea.vmem %s419_s26, 2048  ;;  %p597_p11 = scmp.lt.s32.totalorder %s419_s26, %s419_s26 }
  0x30   :  { %269 = vmatprep.subr.bf16.mxu0 %v519_v10  ;;  %470 = vmatprep.subr.bf16.mxu1 %v519_v10  ;;  %p593_p10 = scmp.ne.s32.totalorder %s419_s26, %s592_s27  ;;  %p598_p12 = scmp.lt.s32.totalorder %s592_s27, %s592_s27 }
  0x32   :  { %p599_p13 = por %p598_p12, %p597_p11 }
  0x33   :  { %270 = vmatpush1.bf16.msra.mxu0 %v521_v11  ;;  %486 = vmatpush1.bf16.msra.mxu1 %v521_v11 }
  0x34   :  { %271 = vmatprep.subr.bf16.mxu0 %v522_v12  ;;  %471 = vmatprep.subr.bf16.mxu1 %v522_v12  ;;  %p600_p0 = pnand %p599_p13, %p593_p10 }
  0x37   :  { %272 = vmatpush1.bf16.msra.mxu0 %v524_v18  ;;  %487 = vmatpush1.bf16.msra.mxu1 %v524_v18 }
  0x38   :  { %273 = vmatprep.subr.bf16.mxu0 %v525_v20  ;;  %472 = vmatprep.subr.bf16.mxu1 %v525_v20 }
  0x3b   :  { %274 = vmatpush1.bf16.msra.mxu0 %v527_v21  ;;  %488 = vmatpush1.bf16.msra.mxu1 %v527_v21 }
  0x3c   :  { %275 = vmatprep.subr.bf16.mxu0 %v528_v22  ;;  %473 = vmatprep.subr.bf16.mxu1 %v528_v22 }
  0x3f   :  { %276 = vmatpush2.bf16.msra.mxu0 %v530_v23  ;;  %489 = vmatpush2.bf16.msra.mxu1 %v530_v23 }
  0x40   :  { %277 = vmatprep.subr.bf16.mxu0 %v531_v24  ;;  %474 = vmatprep.subr.bf16.mxu1 %v531_v24 }
  0x43   :  { %278 = vmatpush2.bf16.msra.mxu0 %v533_v25  ;;  %490 = vmatpush2.bf16.msra.mxu1 %v533_v25 }
  0x44   :  { %279 = vmatprep.subr.bf16.mxu0 %v534_v26  ;;  %475 = vmatprep.subr.bf16.mxu1 %v534_v26 }
  0x47   :  { %280 = vmatpush2.bf16.msra.mxu0 %v536_v27  ;;  %491 = vmatpush2.bf16.msra.mxu1 %v536_v27 }
  0x48   :  { %281 = vmatprep.subr.bf16.mxu0 %v537_v28  ;;  %476 = vmatprep.subr.bf16.mxu1 %v537_v28 }
  0x4b   :  { %282 = vmatpush2.bf16.msra.mxu0 %v539_v29  ;;  %492 = vmatpush2.bf16.msra.mxu1 %v539_v29 }
  0x4c   :  { %283 = vmatprep.subr.bf16.mxu0 %v540_v30  ;;  %477 = vmatprep.subr.bf16.mxu1 %v540_v30 }
  0x4f   :  { %284 = vmatpush2.bf16.msra.mxu0 %v542_v31  ;;  %493 = vmatpush2.bf16.msra.mxu1 %v542_v31 }
  0x50   :  { %285 = vmatprep.subr.bf16.mxu0 %v543_v32  ;;  %478 = vmatprep.subr.bf16.mxu1 %v543_v32 }
  0x53   :  { %286 = vmatpush2.bf16.msra.mxu0 %v545_v33  ;;  %494 = vmatpush2.bf16.msra.mxu1 %v545_v33 }
  0x54   :  { %287 = vmatprep.subr.bf16.mxu0 %v546_v34  ;;  %479 = vmatprep.subr.bf16.mxu1 %v546_v34 }
  0x57   :  { %288 = vmatpush2.bf16.msra.mxu0 %v548_v35  ;;  %495 = vmatpush2.bf16.msra.mxu1 %v548_v35 }
  0x58   :  { %289 = vmatprep.subr.bf16.mxu0 %v549_v36  ;;  %480 = vmatprep.subr.bf16.mxu1 %v549_v36 }
  0x5b   :  { %290 = vmatpush2.bf16.msra.mxu0 %v551_v37  ;;  %496 = vmatpush2.bf16.msra.mxu1 %v551_v37 }
  0x5e   :  { %292 = vmatmul.mubr.bf16.vlgmr.msra.gmra.mxu0 %v59_v46  ;;  %312 = vmatmul.mubr.bf16.vlgmr.msra.gmra.mxu1 %v63_v47 }
  0x5f   :  { %301 = vmatprep.mubr.bf16.mxu0 %v62_v48  ;;  %321 = vmatprep.mubr.bf16.mxu1 %v66_v49 }
  0x66   :  { %302 = vmatmul.mubr.bf16.gmra.mxu0 %v61_v54  ;;  %322 = vmatmul.mubr.bf16.gmra.mxu1 %v65_v55 }
 0x11e   :  { %v293_v62 = vpop.f32.mrf.mxu0  ;;  %v313_v63 = vpop.f32.mrf.mxu1 }
 0x11f   :  { %v353_v0 = vadd.f32 %v293_v62, %v43_v38  ;;  %v361_v1 = vadd.f32 %v313_v63, %v51_v40 }
 0x120   :  { %v295_v3 = vpop.f32.mrf.mxu0  ;;  %v315_v4 = vpop.f32.mrf.mxu1 }
 0x121   :  { %v381_v5 = vadd.f32 %v374_v61, %v353_v0  ;;  %v389_v6 = vadd.f32 %v374_v61, %v361_v1  ;;  %v354_v7 = vadd.f32 %v295_v3, %v654_v13  ;;  %v362_v8 = vadd.f32 %v315_v4, %v660_v16 }
 0x122   :  { %v297_v9 = vpop.f32.mrf.mxu0  ;;  %v317_v10 = vpop.f32.mrf.mxu1 }
 0x123   :  { %397 = vst [vmem:[#allocation7] sm:$0xff] %v381_v5  ;;  %405 = vst [vmem:[#allocation7 + $0x40] sm:$0xff] %v389_v6  ;;  %v382_v11 = vadd.f32 %v378_v2, %v354_v7  ;;  %v390_v12 = vadd.f32 %v378_v2, %v362_v8  ;;  %v355_v15 = vadd.f32 %v297_v9, %v45_v39 }
 0x124   :  { %v363_v18 = vadd.f32 %v317_v10, %v53_v41  ;;  %v299_v19 = vpop.f32.mrf.mxu0  ;;  %v319_v20 = vpop.f32.mrf.mxu1 }
 0x125   :  { %398 = vst [vmem:[#allocation7 + $0x8] sm:$0xff] %v382_v11  ;;  %406 = vst [vmem:[#allocation7 + $0x48] sm:$0xff] %v390_v12  ;;  %v383_v21 = vadd.f32 %v374_v61, %v355_v15  ;;  %v356_v23 = vadd.f32 %v299_v19, %v656_v14  ;;  %v364_v13 = vadd.f32 %v319_v20, %v662_v17 }
 0x126   :  { %v391_v22 = vadd.f32 %v374_v61, %v363_v18  ;;  %v303_v24 = vpop.f32.mrf.mxu0  ;;  %v323_v16 = vpop.f32.mrf.mxu1 }
 0x127   :  { %399 = vst [vmem:[#allocation7 + $0x10] sm:$0xff] %v383_v21  ;;  %v384_v25 = vadd.f32 %v378_v2, %v356_v23  ;;  %v392_v26 = vadd.f32 %v378_v2, %v364_v13  ;;  %v357_v27 = vadd.f32 %v303_v24, %v47_v50  ;;  %v365_v28 = vadd.f32 %v323_v16, %v55_v52 }
 0x128   :  { %407 = vst [vmem:[#allocation7 + $0x50] sm:$0xff] %v391_v22  ;;  %v305_v29 = vpop.f32.mrf.mxu0  ;;  %v325_v30 = vpop.f32.mrf.mxu1 }
 0x129   :  { %400 = vst [vmem:[#allocation7 + $0x18] sm:$0xff] %v384_v25  ;;  %408 = vst [vmem:[#allocation7 + $0x58] sm:$0xff] %v392_v26  ;;  %v385_v31 = vadd.f32 %v374_v61, %v357_v27  ;;  %v393_v32 = vadd.f32 %v374_v61, %v365_v28  ;;  %v358_v33 = vadd.f32 %v305_v29, %v666_v42 }
 0x12a   :  { %v366_v14 = vadd.f32 %v325_v30, %v670_v44  ;;  %v307_v34 = vpop.f32.mrf.mxu0  ;;  %v327_v17 = vpop.f32.mrf.mxu1 }
 0x12b   :  { %401 = vst [vmem:[#allocation7 + $0x20] sm:$0xff] %v385_v31  ;;  %409 = vst [vmem:[#allocation7 + $0x60] sm:$0xff] %v393_v32  ;;  %v386_v35 = vadd.f32 %v378_v2, %v358_v33  ;;  %v359_v37 = vadd.f32 %v307_v34, %v49_v51  ;;  %v367_v38 = vadd.f32 %v327_v17, %v57_v53 }
 0x12c   :  { %v394_v36 = vadd.f32 %v378_v2, %v366_v14  ;;  %v309_v39 = vpop.f32.mrf.mxu0  ;;  %v329_v40 = vpop.f32.mrf.mxu1 }
 0x12d   :  { %402 = vst [vmem:[#allocation7 + $0x28] sm:$0xff] %v386_v35  ;;  %v387_v41 = vadd.f32 %v374_v61, %v359_v37  ;;  %v395_v46 = vadd.f32 %v374_v61, %v367_v38  ;;  %v360_v42 = vadd.f32 %v309_v39, %v668_v43  ;;  %v368_v44 = vadd.f32 %v329_v40, %v672_v45 }
 0x12e   :  { %410 = vst [vmem:[#allocation7 + $0x68] sm:$0xff] %v394_v36 }
 0x12f   :  { %403 = vst [vmem:[#allocation7 + $0x30] sm:$0xff] %v387_v41  ;;  %411 = vst [vmem:[#allocation7 + $0x70] sm:$0xff] %v395_v46  ;;  %v388_v47 = vadd.f32 %v378_v2, %v360_v42  ;;  %v396_v48 = vadd.f32 %v378_v2, %v368_v44 }
 0x131   :  { %404 = vst [vmem:[#allocation7 + $0x38] sm:$0xff] %v388_v47  ;;  %412 = vst [vmem:[#allocation7 + $0x78] sm:$0xff] %v396_v48 }
 0x132   :  { %603 = shalt.err (!%p600_p0)
}
 0x133   :  { %424 = dma.vmem_to_hbm [thread:$0]  %s419_s26, 2048, %s698_s3, [#allocation4], %s619_s15, %s619_s15, %s620_s16  }
 0x134   :  { %616 = dma.done.wait [#allocation4], 2048  }
 0x135   :  { %617 = vsyncadd [#allocation4], 4294965248 }
 0x136   :  { %428 = vsyncpa [#allocation3], 1 }
 0x137   :  { %429 = vsyncpa [#allocation6], 1 }
 0x138   :  { %430 = vsyncpa [#allocation4], 1 }

</bundles_post_ra>
